<compile_context>
chip_gen: v5e
topology: v5e:2x2
jax: 0.10.0
libtpu: 0.0.40
codegen_flags: <defaults>
</compile_context>

<pallas_src>
import jax
import jax.numpy as jnp
from jax.experimental import pallas as pl
from jax.experimental.pallas import tpu as pltpu


def _normalize_kernel(scale_ref, bias_ref, img_ref, out_ref):
    # scale_ref / bias_ref: (row_tile, 1) per-row constants, broadcast over lanes.
    # img_ref / out_ref:    (row_tile, col_tile) lane-dense tiles.
    out_ref[...] = img_ref[...] * scale_ref[...] + bias_ref[...]


def _block_budget_bytes(default=4 * 1024 * 1024):
    """Per-buffer block budget, scaled to the chip's VMEM when queryable.

    Double-buffered img in + out is ~4x one block of live VMEM, so keep the
    block at <= ~1/8 of physical VMEM, clamped to [2 MiB, 8 MiB].
    """
    try:
        info = pltpu.get_tpu_info()
        vmem = getattr(info, "vmem_capacity_bytes", None)
        if vmem:
            return int(max(2 << 20, min(8 << 20, vmem // 8)))
    except Exception:
        pass
    return default


def _choose_tiles(rows, cols, itemsize, max_block_bytes):
    """Pick (row_tile, col_tile) for a cdiv grid over a (rows, cols) array.

    Tiles are (sublane, 128)-aligned or equal to the full dim (always legal),
    respect the per-buffer budget on every path, and guarantee >= 2 grid
    blocks for large arrays so v7x can shard across both TensorCores.
    """
    sub = max(8, 32 // itemsize)  # sublane granularity: 8 f32, 16 bf16, 32 int8
    lane = 128

    # ---- column tile (lane-dense last dim) ----
    max_cols = max(lane, (max_block_bytes // (itemsize * sub)) // lane * lane)
    if cols <= max_cols:
        col_tile = cols  # full last dim: always legal, even if not /128
    else:
        # Prefer the largest multiple-of-128 divisor under budget (no masked
        # edge blocks) ...
        col_tile = 0
        for t in range(max_cols, lane - 1, -lane):
            if cols % t == 0:
                col_tile = t
                break
        # ... but never fall back to a tiny tile: use a large aligned
        # non-dividing tile instead (cdiv grid, masked last block only).
        if col_tile * itemsize * sub < min(max_block_bytes, 1 << 20):
            col_tile = max_cols

    # ---- row tile (sublane-aligned second-to-last dim), budget-clamped ----
    max_rows = max(1, max_block_bytes // (itemsize * col_tile))
    if rows < sub:
        row_tile = rows  # full dim: legal even when not a multiple of sub
    else:
        row_tile = max(sub, (min(rows, max_rows) // sub) * sub)

    # ---- guarantee >= 2 blocks on a parallel axis for big arrays (v7x) ----
    n_blocks = pl.cdiv(rows, row_tile) * pl.cdiv(cols, col_tile)
    if n_blocks < 2:
        blk_bytes = row_tile * col_tile * itemsize
        if rows >= 2 * sub and blk_bytes >= (2 << 20):
            row_tile = pl.cdiv(pl.cdiv(rows, 2), sub) * sub
        elif cols >= 2 * lane and cols % lane == 0 and blk_bytes >= (2 << 20):
            col_tile = pl.cdiv(pl.cdiv(cols, 2), lane) * lane

    return row_tile, col_tile


def normalization(img, mean, std):
    """Pallas equivalent of ptnst Normalization.forward: (img - mean) / std.

    img:  (N, C, H, W)
    mean: (C,)
    std:  (C,)
    """
    N, C, H, W = img.shape
    rows, cols = N * C, H * W
    itemsize = jnp.dtype(img.dtype).itemsize

    # Lane-dense 2-D view; rows are ordered n*C + c (contiguous NCHW reshape).
    x = img.reshape(rows, cols)

    # Per-channel scale/bias computed once in the wrapper (scalar cost),
    # tiled to one value per (n, c) row.
    inv_std = 1.0 / std
    scale = jnp.tile(inv_std, N).reshape(rows, 1).astype(img.dtype)
    bias = jnp.tile(-mean * inv_std, N).reshape(rows, 1).astype(img.dtype)

    budget = _block_budget_bytes()
    row_tile, col_tile = _choose_tiles(rows, cols, itemsize, budget)
    grid = (pl.cdiv(rows, row_tile), pl.cdiv(cols, col_tile))

    # Double-buffered img in + out (~4x block) + scale/bias blocks + headroom.
    block_bytes = row_tile * col_tile * itemsize
    const_bytes = 2 * row_tile * itemsize
    vmem_limit = int(
        min(48 << 20, max(16 << 20, 4 * block_bytes + 4 * const_bytes + (2 << 20)))
    )

    # TODO(synk): could pass input_output_aliases={2: 0} for in-place reuse of
    # the image buffer, but keep out-of-place to match nn.Module semantics.
    out2d = pl.pallas_call(
        _normalize_kernel,
        out_shape=jax.ShapeDtypeStruct((rows, cols), img.dtype),
        grid=grid,
        in_specs=[
            pl.BlockSpec((row_tile, 1), lambda i, j: (i, 0)),
            pl.BlockSpec((row_tile, 1), lambda i, j: (i, 0)),
            pl.BlockSpec((row_tile, col_tile), lambda i, j: (i, j)),
        ],
        out_specs=pl.BlockSpec((row_tile, col_tile), lambda i, j: (i, j)),
        compiler_params=pltpu.CompilerParams(
            dimension_semantics=("parallel", "parallel"),
            vmem_limit_bytes=vmem_limit,
        ),
    )(scale, bias, x)

    return out2d.reshape(N, C, H, W)


if __name__ == "__main__":
    key = jax.random.PRNGKey(0)
    N, C, H, W = 2, 3, 16, 16  # RGB-style image, matches the module's intent

    img = jax.random.uniform(key, (N, C, H, W), dtype=jnp.float32)

    # Deterministic per-channel normalization constants (ImageNet-style).
    mean = jnp.asarray([0.485, 0.456, 0.406], dtype=jnp.float32)
    std = jnp.asarray([0.229, 0.224, 0.225], dtype=jnp.float32)

    out = jax.block_until_ready(normalization(img, mean, std))

    # Reference check (plain JAX, mirrors PyTorch broadcasting of (-1,1,1)).
    # Slightly looser tolerance: (x*inv_s + bias) differs from (x-m)/s by ~1 ulp.
    ref = (img - mean.reshape(-1, 1, 1)) / std.reshape(-1, 1, 1)
    assert out.shape == img.shape
    assert jnp.allclose(out, ref, atol=1e-5, rtol=1e-5)

    print("KERNEL_OK")
</pallas_src>

<mosaic_0001>
module attributes {stable_mosaic.version = 11 : i64} {
  func.func @_normalize_kernel(%arg0: i32, %arg1: i32, %arg2: memref<6x1xf32, #tpu.memory_space<vmem>>, %arg3: memref<6x1xf32, #tpu.memory_space<vmem>>, %arg4: memref<6x256xf32, #tpu.memory_space<vmem>>, %arg5: memref<6x256xf32, #tpu.memory_space<vmem>>) attributes {dimension_semantics = [#tpu.dimension_semantics<parallel>, #tpu.dimension_semantics<parallel>], iteration_bounds = array<i64: 1, 1>, scalar_prefetch = 0 : i64, scratch_operands = 0 : i64, tpu.core_type = #tpu.core_type<tc>, window_params = [{transform_indices = @transform_0, window_bounds = array<i64: 6, 1>}, {transform_indices = @transform_1, window_bounds = array<i64: 6, 1>}, {transform_indices = @transform_2, window_bounds = array<i64: 6, 256>}, {transform_indices = @transform_3, window_bounds = array<i64: 6, 256>}]} {
    %c0 = arith.constant 0 : index
    %c0_0 = arith.constant 0 : index
    %0 = vector.load %arg4[%c0, %c0_0] : memref<6x256xf32, #tpu.memory_space<vmem>>, vector<6x256xf32>
    %c0_1 = arith.constant 0 : index
    %c0_2 = arith.constant 0 : index
    %1 = vector.load %arg2[%c0_1, %c0_2] : memref<6x1xf32, #tpu.memory_space<vmem>>, vector<6x1xf32>
    %2 = vector.broadcast %1 : vector<6x1xf32> to vector<6x256xf32>
    %3 = arith.mulf %0, %2 : vector<6x256xf32>
    %c0_3 = arith.constant 0 : index
    %c0_4 = arith.constant 0 : index
    %4 = vector.load %arg3[%c0_3, %c0_4] : memref<6x1xf32, #tpu.memory_space<vmem>>, vector<6x1xf32>
    %5 = vector.broadcast %4 : vector<6x1xf32> to vector<6x256xf32>
    %6 = arith.addf %3, %5 : vector<6x256xf32>
    %c0_5 = arith.constant 0 : index
    %c0_6 = arith.constant 0 : index
    %7 = vector.load %arg5[%c0_5, %c0_6] : memref<6x256xf32, #tpu.memory_space<vmem>>, vector<6x256xf32>
    tpu.vector_store %arg5[%c0_5, %c0_6], %6 {strides = array<i32>} : memref<6x256xf32, #tpu.memory_space<vmem>>, vector<6x256xf32>,
    return
  }
  func.func @transform_0(%arg0: i32, %arg1: i32) -> (i32, i32) {
    %c0_i32 = arith.constant 0 : i32
    %c0_i32_0 = arith.constant 0 : i32
    return %arg0, %c0_i32 : i32, i32
  }
  func.func @transform_1(%arg0: i32, %arg1: i32) -> (i32, i32) {
    %c0_i32 = arith.constant 0 : i32
    %c0_i32_0 = arith.constant 0 : i32
    return %arg0, %c0_i32 : i32, i32
  }
  func.func @transform_2(%arg0: i32, %arg1: i32) -> (i32, i32) {
    %c0_i32 = arith.constant 0 : i32
    return %arg0, %arg1 : i32, i32
  }
  func.func @transform_3(%arg0: i32, %arg1: i32) -> (i32, i32) {
    %c0_i32 = arith.constant 0 : i32
    return %arg0, %arg1 : i32, i32
  }
}

</mosaic_0001>

<bundles_post_ra>
// kernel: tpu_custom_call.1
= control target key start
LH: loop header
LB: loop body
LE: loop exit
PB: predicated region body
PF: predicated region fallthrough
CT: control target
= control target key end

     0   :  { %v80_v1 = vmov 0   ;;  %s117_s0 = inlined_call_operand.vmem [shape: f32[6,1], index: 0, kind: input, shape index: {}]   ;;  %s118_s1 = inlined_call_operand.vmem [shape: f32[6,1], index: 1, kind: input, shape index: {}]   ;;  %s119_s2 = inlined_call_operand.vmem [shape: f32[6,256], index: 2, kind: input, shape index: {}]   ;;  %s120_s3 = inlined_call_operand.hbm [shape: f32[6,256], index: 3, kind: output, shape index: {}]  }
   0x1   :  { %v17_v0 = vld [vmem:[%s117_s0] sm:$0x3f]  ;;  %53 = vset.pattern.permute.xlu0 %v80_v1 }
   0x2   :  { %8 = vsyncpa [#allocation3], 0  ;;  %20 = vperm.xlu0 %53, %v17_v0   ;;  %v25_v2 = vld [vmem:[%s118_s1] sm:$0x3f]  ;;  %v16_v5 = vld [vmem:[%s119_s2 + $0x8] sm:$0x3f] }
   0x3   :  { %v15_v4 = vld [vmem:[%s119_s2] sm:$0x3f]  ;;  %s81_s0 = smov [#allocation2]   ;;  %s42_s23 = sshll.u32 %s120_s3, 4  ;;  %s43_s23 = int_to_ptr.hbm [resolvable:$true] %s42_s23 }
   0x4   :  { %s40_s20 = sshll.u32 %s81_s0, 4  ;;  %s41_s20 = int_to_ptr.vmem [resolvable:$true] %s40_s20 }
   0xa   :  { %28 = vperm.xlu0 %53, %v25_v2  }
  0x74   :  { %v21_v3 = vpop.permute.xlu0 %20 }
  0x75   :  { %v23_v6 = vmul.f32 %v21_v3, %v15_v4  ;;  %v24_v7 = vmul.f32 %v21_v3, %v16_v5 }
  0x7c   :  { %v29_v8 = vpop.permute.xlu0 %28 }
  0x7d   :  { %v31_v9 = vadd.f32 %v29_v8, %v23_v6  ;;  %v32_v10 = vadd.f32 %v29_v8, %v24_v7 }
  0x7f   :  { %33 = vst [vmem:[#allocation2] sm:$0x3f] %v31_v9 }
  0x80   :  { %34 = vst [vmem:[#allocation2 + $0x8] sm:$0x3f] %v32_v10 }
  0x81   :  { %45 = dma.vmem_to_hbm [thread:$0]  %s41_s20, 256, %s43_s23, [#allocation3]  }
  0x82   :  { %78 = dma.done.wait [#allocation3], 256  }
  0x83   :  { %79 = vsyncadd [#allocation3], 4294967040 }
  0x84   :  { %50 = vsyncpa [#allocation3], 1 }

</bundles_post_ra>
